<compile_context>
chip_gen: v5e
topology: v5e:2x2
jax: 0.10.0
libtpu: 0.0.40
codegen_flags: <defaults>
</compile_context>

<pallas_src>
import functools

import jax
import jax.numpy as jnp
from jax.experimental import pallas as pl
from jax.experimental.pallas import tpu as pltpu


def _fused_kernel(x_ref, w_ref, gamma_ref, beta_ref, o_ref):
    # x_ref:     (N, H+2, W+2, Ci)   padded input for this group (f32)
    # w_ref:     (3, 3*Ci, Co)       per-kh weight slab, kw folded into rows (bf16)
    # gamma_ref: (1, Co), beta_ref: (1, Co)   (f32)
    # o_ref:     (N, H, W, Co)
    eps = 1e-5
    N, Hp, Wp, Ci = x_ref.shape
    H, W = Hp - 2, Wp - 2
    Co = o_ref.shape[-1]
    M = N * H * W

    # relu33 (padding is zero, so relu-after-pad == pad-after-relu);
    # feed the MXU bf16 operands, keep accumulation in f32.
    x = jnp.maximum(x_ref[...], 0.0).astype(jnp.bfloat16)

    # Fold the kw taps into the contraction dimension:
    #   xw[n, r, w, kw*Ci + c] = x_pad[n, r, w + kw, c]      -> (N, Hp, W, 3*Ci)
    xw = jnp.concatenate(
        [x[:, :, 0:W, :], x[:, :, 1:W + 1, :], x[:, :, 2:W + 2, :]], axis=-1)

    # Conv = 3 matmuls (one per kh), each with K = 3*Ci.
    acc = jnp.zeros((M, Co), jnp.float32)
    for kh in range(3):
        patch = xw[:, kh:kh + H, :, :].reshape(M, 3 * Ci)
        acc = acc + jnp.dot(patch, w_ref[kh],
                            preferred_element_type=jnp.float32)

    # BatchNorm2d, training-mode biased batch statistics, single pass:
    #   var = E[x^2] - mean^2 (f32 accumulate keeps this numerically safe).
    inv_m = 1.0 / M
    mean = jnp.sum(acc, axis=0, keepdims=True) * inv_m
    ex2 = jnp.sum(acc * acc, axis=0, keepdims=True) * inv_m
    var = jnp.maximum(ex2 - mean * mean, 0.0)
    inv = jax.lax.rsqrt(var + eps)

    # Fold affine into one fused multiply-add over (M, Co).
    scale = gamma_ref[...] * inv                # (1, Co)
    shift = beta_ref[...] - mean * scale        # (1, Co)
    y = jnp.maximum(acc * scale + shift, 0.0)   # relu34

    o_ref[...] = y.reshape(N, H, W, Co).astype(o_ref.dtype)


@functools.partial(jax.jit, static_argnames=("groups",))
def relu_gconv_bn_relu(x_nchw, weight_oihw, gamma, beta, *, groups):
    N, C, H, W = x_nchw.shape
    Cout = weight_oihw.shape[0]
    Ci = C // groups           # in-channels per group
    Co = Cout // groups        # out-channels per group
    Hp, Wp = H + 2, W + 2

    # Single relayout in: NCHW -> (G, N, H, W, Ci), then spatial zero-pad.
    xg = x_nchw.reshape(N, groups, Ci, H, W).transpose(1, 0, 3, 4, 2)
    xg = jnp.pad(xg, ((0, 0), (0, 0), (1, 1), (1, 1), (0, 0)))          # (G,N,Hp,Wp,Ci)

    # OIHW -> (G, 3, 3*Ci, Co), kw stacked along the contraction rows, bf16.
    wg = weight_oihw.reshape(groups, Co, Ci, 3, 3).transpose(0, 3, 4, 2, 1)  # (G,3,3,Ci,Co)
    wg = wg.reshape(groups, 3, 3 * Ci, Co).astype(jnp.bfloat16)
    gg = gamma.reshape(groups, 1, Co).astype(jnp.float32)
    bg = beta.reshape(groups, 1, Co).astype(jnp.float32)

    # BN batch statistics require the full (N, H, W) extent of a group in one
    # block, so the grid is over groups only (fine at the production shape
    # 1x1392x14x14; a tiled-N path with cross-step sum/sumsq accumulation
    # would be needed only if N or H*W grows far beyond that).
    out = pl.pallas_call(
        _fused_kernel,
        out_shape=jax.ShapeDtypeStruct((groups, N, H, W, Co), x_nchw.dtype),
        grid_spec=pltpu.PrefetchScalarGridSpec(
            num_scalar_prefetch=0,
            grid=(groups,),
            in_specs=[
                pl.BlockSpec((None, N, Hp, Wp, Ci), lambda g: (g, 0, 0, 0, 0)),
                pl.BlockSpec((None, 3, 3 * Ci, Co), lambda g: (g, 0, 0, 0)),
                pl.BlockSpec((None, 1, Co), lambda g: (g, 0, 0)),
                pl.BlockSpec((None, 1, Co), lambda g: (g, 0, 0)),
            ],
            out_specs=pl.BlockSpec((None, N, H, W, Co), lambda g: (g, 0, 0, 0, 0)),
        ),
        compiler_params=pltpu.CompilerParams(
            dimension_semantics=("parallel",),
            vmem_limit_bytes=64 * 1024 * 1024),
    )(xg, wg, gg, bg)

    # Single relayout out: (G, N, H, W, Co) -> NCHW with PyTorch grouped order.
    return out.transpose(1, 0, 4, 2, 3).reshape(N, groups * Co, H, W)


def _reference(x, weight, gamma, beta, groups, eps=1e-5):
    # Pure-JAX f32 reference of the PyTorch forward (training-mode BN).
    x = jnp.maximum(x, 0.0)
    y = jax.lax.conv_general_dilated(
        x, weight, window_strides=(1, 1), padding=((1, 1), (1, 1)),
        feature_group_count=groups,
        dimension_numbers=("NCHW", "OIHW", "NCHW"))
    mean = y.mean(axis=(0, 2, 3), keepdims=True)
    var = ((y - mean) ** 2).mean(axis=(0, 2, 3), keepdims=True)
    y = (y - mean) * jax.lax.rsqrt(var + eps) * gamma.reshape(1, -1, 1, 1) \
        + beta.reshape(1, -1, 1, 1)
    return jnp.maximum(y, 0.0)


if __name__ == "__main__":
    # Small shapes consistent with the module: grouped 3x3 conv with groups=6.
    # (original module: x of shape 1x1392x14x14, groups=6 -> 232 ch/group)
    N, C, H, W = 2, 24, 8, 8
    groups = 6
    Ci = C // groups

    key = jax.random.PRNGKey(0)
    kx, kw, kg, kb = jax.random.split(key, 4)
    x = jax.random.normal(kx, (N, C, H, W), jnp.float32)
    weight = jax.random.normal(kw, (C, Ci, 3, 3), jnp.float32) * 0.1   # OIHW
    gamma = 1.0 + 0.1 * jax.random.normal(kg, (C,), jnp.float32)
    beta = 0.1 * jax.random.normal(kb, (C,), jnp.float32)

    out = relu_gconv_bn_relu(x, weight, gamma, beta, groups=groups)
    out = jax.block_until_ready(out)

    ref = _reference(x, weight, gamma, beta, groups)
    assert out.shape == (N, C, H, W)
    # Conv runs in bf16 (f32 accumulation), so compare with a loosened tolerance.
    assert jnp.allclose(out, ref, rtol=5e-2, atol=5e-2), "mismatch vs reference"

    print("KERNEL_OK")
</pallas_src>

<mosaic_0001>
module attributes {stable_mosaic.version = 11 : i64} {
  func.func @_fused_kernel(%arg0: i32, %arg1: memref<1x2x10x10x4xf32, #tpu.memory_space<vmem>>, %arg2: memref<1x3x12x4xbf16, #tpu.memory_space<vmem>>, %arg3: memref<1x1x4xf32, #tpu.memory_space<vmem>>, %arg4: memref<1x1x4xf32, #tpu.memory_space<vmem>>, %arg5: memref<1x2x8x8x4xf32, #tpu.memory_space<vmem>>) attributes {dimension_semantics = [#tpu.dimension_semantics<parallel>], iteration_bounds = array<i64: 6>, scalar_prefetch = 0 : i64, scratch_operands = 0 : i64, tpu.core_type = #tpu.core_type<tc>, window_params = [{transform_indices = @transform_0, window_bounds = array<i64: 1, 2, 10, 10, 4>}, {transform_indices = @transform_1, window_bounds = array<i64: 1, 3, 12, 4>}, {transform_indices = @transform_2, window_bounds = array<i64: 1, 1, 4>}, {transform_indices = @transform_3, window_bounds = array<i64: 1, 1, 4>}, {transform_indices = @transform_4, window_bounds = array<i64: 1, 2, 8, 8, 4>}]} {
    %c0 = arith.constant 0 : index
    %c0_0 = arith.constant 0 : index
    %c0_1 = arith.constant 0 : index
    %c0_2 = arith.constant 0 : index
    %c0_3 = arith.constant 0 : index
    %0 = vector.load %arg1[%c0, %c0_0, %c0_1, %c0_2, %c0_3] : memref<1x2x10x10x4xf32, #tpu.memory_space<vmem>>, vector<1x2x10x10x4xf32>
    %1 = vector.shape_cast %0 : vector<1x2x10x10x4xf32> to vector<2x10x10x4xf32>
    %cst = arith.constant 0.000000e+00 : f32
    %2 = vector.broadcast %cst : f32 to vector<2x10x10x4xf32>
    %3 = arith.maximumf %1, %2 : vector<2x10x10x4xf32>
    %4 = arith.truncf %3 : vector<2x10x10x4xf32> to vector<2x10x10x4xbf16>
    %5 = vector.extract_strided_slice %4 {offsets = [0, 0, 0, 0], sizes = [2, 10, 8, 4], strides = [1, 1, 1, 1]} : vector<2x10x10x4xbf16> to vector<2x10x8x4xbf16>
    %6 = vector.extract_strided_slice %4 {offsets = [0, 0, 1, 0], sizes = [2, 10, 8, 4], strides = [1, 1, 1, 1]} : vector<2x10x10x4xbf16> to vector<2x10x8x4xbf16>
    %7 = vector.extract_strided_slice %4 {offsets = [0, 0, 2, 0], sizes = [2, 10, 8, 4], strides = [1, 1, 1, 1]} : vector<2x10x10x4xbf16> to vector<2x10x8x4xbf16>
    %8 = tpu.concatenate %5, %6, %7 in 3 : vector<2x10x8x4xbf16>, vector<2x10x8x4xbf16>, vector<2x10x8x4xbf16> -> vector<2x10x8x12xbf16>
    %cst_4 = arith.constant 0.000000e+00 : f32
    %9 = vector.broadcast %cst_4 : f32 to vector<128x4xf32>
    %10 = vector.extract_strided_slice %8 {offsets = [0, 0, 0, 0], sizes = [2, 8, 8, 12], strides = [1, 1, 1, 1]} : vector<2x10x8x12xbf16> to vector<2x8x8x12xbf16>
    %11 = vector.shape_cast %10 : vector<2x8x8x12xbf16> to vector<128x12xbf16>
    %c0_5 = arith.constant 0 : index
    %c0_6 = arith.constant 0 : index
    %c0_7 = arith.constant 0 : index
    %c0_8 = arith.constant 0 : index
    %12 = vector.load %arg2[%c0_5, %c0_6, %c0_7, %c0_8] : memref<1x3x12x4xbf16, #tpu.memory_space<vmem>>, vector<1x1x12x4xbf16>
    %13 = vector.shape_cast %12 : vector<1x1x12x4xbf16> to vector<12x4xbf16>
    %cst_9 = arith.constant dense<0.000000e+00> : vector<128x4xf32>
    %14 = tpu.matmul %11, %13, %cst_9 {dimension_numbers = #tpu.dot_dimension_numbers<[1], [0], [0], [1], [0, 0, 1, 1], [], []>} : vector<128x12xbf16>, vector<12x4xbf16>, vector<128x4xf32> -> vector<128x4xf32>
    %15 = arith.addf %9, %14 : vector<128x4xf32>
    %16 = vector.extract_strided_slice %8 {offsets = [0, 1, 0, 0], sizes = [2, 8, 8, 12], strides = [1, 1, 1, 1]} : vector<2x10x8x12xbf16> to vector<2x8x8x12xbf16>
    %17 = vector.shape_cast %16 : vector<2x8x8x12xbf16> to vector<128x12xbf16>
    %c0_10 = arith.constant 0 : index
    %c1 = arith.constant 1 : index
    %c0_11 = arith.constant 0 : index
    %c0_12 = arith.constant 0 : index
    %18 = vector.load %arg2[%c0_10, %c1, %c0_11, %c0_12] : memref<1x3x12x4xbf16, #tpu.memory_space<vmem>>, vector<1x1x12x4xbf16>
    %19 = vector.shape_cast %18 : vector<1x1x12x4xbf16> to vector<12x4xbf16>
    %cst_13 = arith.constant dense<0.000000e+00> : vector<128x4xf32>
    %20 = tpu.matmul %17, %19, %cst_13 {dimension_numbers = #tpu.dot_dimension_numbers<[1], [0], [0], [1], [0, 0, 1, 1], [], []>} : vector<128x12xbf16>, vector<12x4xbf16>, vector<128x4xf32> -> vector<128x4xf32>
    %21 = arith.addf %15, %20 : vector<128x4xf32>
    %22 = vector.extract_strided_slice %8 {offsets = [0, 2, 0, 0], sizes = [2, 8, 8, 12], strides = [1, 1, 1, 1]} : vector<2x10x8x12xbf16> to vector<2x8x8x12xbf16>
    %23 = vector.shape_cast %22 : vector<2x8x8x12xbf16> to vector<128x12xbf16>
    %c0_14 = arith.constant 0 : index
    %c2 = arith.constant 2 : index
    %c0_15 = arith.constant 0 : index
    %c0_16 = arith.constant 0 : index
    %24 = vector.load %arg2[%c0_14, %c2, %c0_15, %c0_16] : memref<1x3x12x4xbf16, #tpu.memory_space<vmem>>, vector<1x1x12x4xbf16>
    %25 = vector.shape_cast %24 : vector<1x1x12x4xbf16> to vector<12x4xbf16>
    %cst_17 = arith.constant dense<0.000000e+00> : vector<128x4xf32>
    %26 = tpu.matmul %23, %25, %cst_17 {dimension_numbers = #tpu.dot_dimension_numbers<[1], [0], [0], [1], [0, 0, 1, 1], [], []>} : vector<128x12xbf16>, vector<12x4xbf16>, vector<128x4xf32> -> vector<128x4xf32>
    %27 = arith.addf %21, %26 : vector<128x4xf32>
    %cst_18 = arith.constant dense<0.000000e+00> : vector<4xf32>
    %28 = vector.multi_reduction <add>, %27, %cst_18 [0] : vector<128x4xf32> to vector<4xf32>
    %29 = vector.shape_cast %28 : vector<4xf32> to vector<1x4xf32>
    %cst_19 = arith.constant 7.812500e-03 : f32
    %30 = vector.broadcast %cst_19 : f32 to vector<1x4xf32>
    %31 = arith.mulf %29, %30 : vector<1x4xf32>
    %32 = arith.mulf %27, %27 : vector<128x4xf32>
    %cst_20 = arith.constant dense<0.000000e+00> : vector<4xf32>
    %33 = vector.multi_reduction <add>, %32, %cst_20 [0] : vector<128x4xf32> to vector<4xf32>
    %34 = vector.shape_cast %33 : vector<4xf32> to vector<1x4xf32>
    %cst_21 = arith.constant 7.812500e-03 : f32
    %35 = vector.broadcast %cst_21 : f32 to vector<1x4xf32>
    %36 = arith.mulf %34, %35 : vector<1x4xf32>
    %37 = arith.mulf %31, %31 : vector<1x4xf32>
    %38 = arith.subf %36, %37 : vector<1x4xf32>
    %cst_22 = arith.constant 0.000000e+00 : f32
    %39 = vector.broadcast %cst_22 : f32 to vector<1x4xf32>
    %40 = arith.maximumf %38, %39 : vector<1x4xf32>
    %cst_23 = arith.constant 9.99999974E-6 : f32
    %41 = vector.broadcast %cst_23 : f32 to vector<1x4xf32>
    %42 = arith.addf %40, %41 : vector<1x4xf32>
    %43 = math.rsqrt %42 : vector<1x4xf32>
    %c0_24 = arith.constant 0 : index
    %c0_25 = arith.constant 0 : index
    %c0_26 = arith.constant 0 : index
    %44 = vector.load %arg3[%c0_24, %c0_25, %c0_26] : memref<1x1x4xf32, #tpu.memory_space<vmem>>, vector<1x1x4xf32>
    %45 = vector.shape_cast %44 : vector<1x1x4xf32> to vector<1x4xf32>
    %46 = arith.mulf %45, %43 : vector<1x4xf32>
    %c0_27 = arith.constant 0 : index
    %c0_28 = arith.constant 0 : index
    %c0_29 = arith.constant 0 : index
    %47 = vector.load %arg4[%c0_27, %c0_28, %c0_29] : memref<1x1x4xf32, #tpu.memory_space<vmem>>, vector<1x1x4xf32>
    %48 = vector.shape_cast %47 : vector<1x1x4xf32> to vector<1x4xf32>
    %49 = arith.mulf %31, %46 : vector<1x4xf32>
    %50 = arith.subf %48, %49 : vector<1x4xf32>
    %51 = vector.broadcast %46 : vector<1x4xf32> to vector<128x4xf32>
    %52 = arith.mulf %27, %51 : vector<128x4xf32>
    %53 = vector.broadcast %50 : vector<1x4xf32> to vector<128x4xf32>
    %54 = arith.addf %52, %53 : vector<128x4xf32>
    %cst_30 = arith.constant 0.000000e+00 : f32
    %55 = vector.broadcast %cst_30 : f32 to vector<128x4xf32>
    %56 = arith.maximumf %54, %55 : vector<128x4xf32>
    %57 = vector.shape_cast %56 : vector<128x4xf32> to vector<2x8x8x4xf32>
    %c0_31 = arith.constant 0 : index
    %c0_32 = arith.constant 0 : index
    %c0_33 = arith.constant 0 : index
    %c0_34 = arith.constant 0 : index
    %c0_35 = arith.constant 0 : index
    %58 = vector.load %arg5[%c0_31, %c0_32, %c0_33, %c0_34, %c0_35] : memref<1x2x8x8x4xf32, #tpu.memory_space<vmem>>, vector<1x2x8x8x4xf32>
    %59 = vector.shape_cast %58 : vector<1x2x8x8x4xf32> to vector<2x8x8x4xf32>
    %60 = vector.shape_cast %57 : vector<2x8x8x4xf32> to vector<1x2x8x8x4xf32>
    tpu.vector_store %arg5[%c0_31, %c0_32, %c0_33, %c0_34, %c0_35], %60 {strides = array<i32>} : memref<1x2x8x8x4xf32, #tpu.memory_space<vmem>>, vector<1x2x8x8x4xf32>,
    return
  }
  func.func @transform_0(%arg0: i32) -> (i32, i32, i32, i32, i32) {
    %c0_i32 = arith.constant 0 : i32
    %c0_i32_0 = arith.constant 0 : i32
    %c0_i32_1 = arith.constant 0 : i32
    %c0_i32_2 = arith.constant 0 : i32
    %c0_i32_3 = arith.constant 0 : i32
    return %arg0, %c0_i32, %c0_i32_0, %c0_i32_1, %c0_i32_2 : i32, i32, i32, i32, i32
  }
  func.func @transform_1(%arg0: i32) -> (i32, i32, i32, i32) {
    %c0_i32 = arith.constant 0 : i32
    %c0_i32_0 = arith.constant 0 : i32
    %c0_i32_1 = arith.constant 0 : i32
    %c0_i32_2 = arith.constant 0 : i32
    return %arg0, %c0_i32, %c0_i32_0, %c0_i32_1 : i32, i32, i32, i32
  }
  func.func @transform_2(%arg0: i32) -> (i32, i32, i32) {
    %c0_i32 = arith.constant 0 : i32
    %c0_i32_0 = arith.constant 0 : i32
    %c0_i32_1 = arith.constant 0 : i32
    return %arg0, %c0_i32, %c0_i32_0 : i32, i32, i32
  }
  func.func @transform_3(%arg0: i32) -> (i32, i32, i32) {
    %c0_i32 = arith.constant 0 : i32
    %c0_i32_0 = arith.constant 0 : i32
    %c0_i32_1 = arith.constant 0 : i32
    return %arg0, %c0_i32, %c0_i32_0 : i32, i32, i32
  }
  func.func @transform_4(%arg0: i32) -> (i32, i32, i32, i32, i32) {
    %c0_i32 = arith.constant 0 : i32
    %c0_i32_0 = arith.constant 0 : i32
    %c0_i32_1 = arith.constant 0 : i32
    %c0_i32_2 = arith.constant 0 : i32
    %c0_i32_3 = arith.constant 0 : i32
    return %arg0, %c0_i32, %c0_i32_0, %c0_i32_1, %c0_i32_2 : i32, i32, i32, i32, i32
  }
}

</mosaic_0001>

<bundles_post_ra>
// kernel: relu_gconv_bn_relu.1
= control target key start
LH: loop header
LB: loop body
LE: loop exit
PB: predicated region body
PF: predicated region fallthrough
CT: control target
= control target key end

     0   :  { %s1491_s15 = smov 0   ;;  %s1962_s0 = inlined_call_operand.vmem [shape: f32[6,2,10,10,4], index: 0, kind: input, shape index: {}]   ;;  %s1963_s1 = inlined_call_operand.vmem [shape: bf16[6,3,12,4], index: 1, kind: input, shape index: {}]   ;;  %s1964_s2 = inlined_call_operand.vmem [shape: f32[6,1,4], index: 2, kind: input, shape index: {}]   ;;  %s1965_s3 = inlined_call_operand.vmem [shape: f32[6,1,4], index: 3, kind: input, shape index: {}]   ;;  %s1966_s4 = inlined_call_operand.vmem [shape: f32[6,2,8,8,4], index: 4, kind: output, shape index: {}]  }
   0x1 LB: > { %s1384_s16 = sadd.s32 4294967295, %s1462_s15   ;;  %p1388_p0 = scmp.ge.s32.totalorder %s1462_s15, 1  ;;  %s1462_s15 = sphi %s1491_s15, %s14_s15  }
   0x2   : > { %p188_p1 = scmp.lt.s32.totalorder %s1462_s15, 7 }
   0x4   : > { %p189_p2 = pnand %p1388_p0, %p188_p1 }
   0x5   : > { %p225_p3 = scmp.lt.s32.totalorder (!%p189_p2), %s1384_s16, 5  ;;  %s1464_s21 = smov (!%p189_p2), 8  }
   0x6   : > { %192 = sbr.rel (%p189_p2) target bundleno = 476 (0x1dc), region = 36  ;;  %s1465_s22 = smov (!%p189_p2), 4  }
   0xb   : > { %s1968_s16 = smov (!%p225_p3, %s1384_s16), 5  ;;  %vm884_vm0 = vcmask 1045504   ;;  %vm707_vm1 = vcmask 31744   ;;  %vm768_vm2 = vcmask 64512   ;;  %vm859_vm3 = vcmask 97280  }
   0xc   : > { %s1442_s17 = smul.u32 320, %s1968_s16  ;;  %s237_s29 = scalar_lea.vmem %s1964_s2, %s1968_s16 }
   0xd   : > { %s1443_s23 = smul.u32 24, %s1968_s16  ;;  %s240_s6 = scalar_lea.vmem %s1965_s3, %s1968_s16 }
   0xe   : > { %s1505_s20 = scalar_lea.vmem %s1962_s0, %s1442_s17  ;;  %s1435_s7 = sshll.u32 %s1968_s16, 7 }
   0xf   : > { %v251_v0 = vld [vmem:[%s1505_s20 + $0x20] sm:$0xff]  ;;  %v252_v1 = vld [vmem:[%s1505_s20 + $0x28] sm:$0x3]  ;;  %v253_v7 = vld [vmem:[%s1505_s20 + $0x30] sm:$0xff]  ;;  %s234_s26 = scalar_lea.vmem %s1963_s1, %s1443_s23  ;;  %s1920_s10 = scalar_lea.vmem %s1966_s4, %s1435_s7 }
  0x10   : > { %v247_v2 = vld [vmem:[%s1505_s20] sm:$0xff]  ;;  %v291_v3 = vmax.f32 %v251_v0, 0.0  ;;  %v292_v4 = vmax.f32 %v252_v1, 0.0  ;;  %v248_v5 = vld [vmem:[%s1505_s20 + $0x8] sm:$0x3]  ;;  %v293_v10 = vmax.f32 %v253_v7, 0.0 }
  0x11   : > { %v287_v6 = vmax.f32 %v247_v2, 0.0  ;;  %v288_v8 = vmax.f32 %v248_v5, 0.0  ;;  %v254_v9 = vld [vmem:[%s1505_s20 + $0x38] sm:$0x3]  ;;  %v249_v11 = vld [vmem:[%s1505_s20 + $0x10] sm:$0xff]  ;;  %v279_v31 = vld [vmem:[%s1505_s20 + $0x100] sm:$0xff] }
  0x12   : > { %v1514_v12 = vpack.c.bf16 %v291_v3, %v291_v3  ;;  %v332_v13 = vpack.c.bf16 %v292_v4, %v292_v4  ;;  %v294_v15 = vmax.f32 %v254_v9, 0.0  ;;  %v250_v16 = vld [vmem:[%s1505_s20 + $0x18] sm:$0x3]  ;;  %v1519_v18 = vpack.c.bf16 %v293_v10, %v293_v10  ;;  %v277_v21 = vld [vmem:[%s1505_s20 + $0xf0] sm:$0xff]  ;;  %v280_v47 = vld [vmem:[%s1505_s20 + $0x108] sm:$0x3] }
  0x13   : > { %v1516_v14 = vpack.c.bf16 %v287_v6, %v287_v6  ;;  %v328_v17 = vpack.c.bf16 %v288_v8, %v288_v8  ;;  %v289_v19 = vmax.f32 %v249_v11, 0.0  ;;  %v290_v20 = vmax.f32 %v250_v16, 0.0  ;;  %v278_v26 = vld [vmem:[%s1505_s20 + $0xf8] sm:$0x3]  ;;  %v257_v52 = vld [vmem:[%s1505_s20 + $0x50] sm:$0xff]  ;;  %v255_v57 = vld [vmem:[%s1505_s20 + $0x40] sm:$0xff] }
  0x14   : > { %v411_v22 = vunpack.c.l.b16 %v1514_v12  ;;  %v412_v23 = vunpack.c.l.b16 %v332_v13  ;;  %v334_v25 = vpack.c.bf16 %v294_v15, %v294_v15  ;;  %v413_v28 = vunpack.c.l.b16 %v1519_v18  ;;  %v258_v53 = vld [vmem:[%s1505_s20 + $0x58] sm:$0x3]  ;;  %v256_v58 = vld [vmem:[%s1505_s20 + $0x48] sm:$0x3] }
  0x15   : > { %v407_v24 = vunpack.c.l.b16 %v1516_v14  ;;  %v408_v27 = vunpack.c.l.b16 %v328_v17  ;;  %v1526_v29 = vpack.c.bf16 %v289_v19, %v289_v19  ;;  %v330_v30 = vpack.c.bf16 %v290_v20, %v290_v20 }
  0x16   : > { %v449_v32 = vpack.c.b16 %v412_v23, %v411_v22  ;;  %v414_v33 = vunpack.c.l.b16 %v334_v25  ;;  %v317_v34 = vmax.f32 %v277_v21, 0.0  ;;  %v318_v38 = vmax.f32 %v278_v26, 0.0  ;;  %v281_v22 = vld [vmem:[%s1505_s20 + $0x110] sm:$0xff]  ;;  %v282_v23 = vld [vmem:[%s1505_s20 + $0x118] sm:$0x3] }
  0x17   : > { %v447_v35 = vpack.c.b16 %v408_v27, %v407_v24  ;;  %v409_v36 = vunpack.c.l.b16 %v1526_v29  ;;  %v410_v37 = vunpack.c.l.b16 %v330_v30  ;;  %v319_v42 = vmax.f32 %v279_v31, 0.0 }
  0x18   : > { %v649_v39 = vrot.slane %v449_v32, 1  ;;  %v450_v40 = vpack.c.b16 %v414_v33, %v413_v28  ;;  %v484_v41 = vshll.u32 %v449_v32, 16  ;;  %v482_v44 = vshrl.u32 %v449_v32, 16 }
  0x19   : > { %v647_v43 = vrot.slane %v447_v35, 1  ;;  %v468_v45 = vshrl.u32 %v447_v35, 16  ;;  %v470_v46 = vshll.u32 %v447_v35, 16  ;;  %v1533_v50 = vpack.c.bf16 %v317_v34, %v317_v34 }
  0x1a   : > { %671 = vrot.lane.b32.xlu1 %v649_v39, %s1464_s21  ;;  %v486_v48 = vrot.slane %v484_v41, 1  ;;  %v358_v51 = vpack.c.bf16 %v318_v38, %v318_v38  ;;  %v448_v54 = vpack.c.b16 %v410_v37, %v409_v36  ;;  %v320_v55 = vmax.f32 %v280_v47, 0.0  ;;  %v283_v41 = vld [vmem:[%s1505_s20 + $0x120] sm:$0xff] }
  0x1b   : > { %667 = vrot.lane.b32.xlu0 %v647_v43, %s1464_s21  ;;  %v472_v49 = vrot.slane %v470_v46, 1  ;;  %v1537_v56 = vpack.c.bf16 %v319_v42, %v319_v42  ;;  %v650_v59 = vrot.slane %v450_v40, 1  ;;  %v491_v61 = vshll.u32 %v450_v40, 16  ;;  %v284_v42 = vld [vmem:[%s1505_s20 + $0x128] sm:$0x3] }
  0x1c   : > { %v487_v60 = vor.u32 %v486_v48, %v482_v44  ;;  %v437_v63 = vunpack.c.l.b16 %v1533_v50  ;;  %v360_v0 = vpack.c.bf16 %v320_v55, %v320_v55  ;;  %v297_v1 = vmax.f32 %v257_v52, 0.0 }
  0x1d   : > { %v473_v62 = vor.u32 %v472_v49, %v468_v45  ;;  %v298_v2 = vmax.f32 %v258_v53, 0.0  ;;  %v438_v3 = vunpack.c.l.b16 %v358_v51  ;;  %v439_v4 = vunpack.c.l.b16 %v1537_v56 }
  0x1e   : > { %v295_v5 = vmax.f32 %v255_v57, 0.0  ;;  %v296_v6 = vmax.f32 %v256_v58, 0.0  ;;  %v440_v7 = vunpack.c.l.b16 %v360_v0  ;;  %v475_v8 = vshrl.u32 %v448_v54, 16 }
  0x1f   : > { %607 = vrot.lane.b32.xlu2 %v473_v62, %s1465_s22  ;;  %v477_v9 = vshll.u32 %v448_v54, 16  ;;  %v489_v10 = vshrl.u32 %v450_v40, 16  ;;  %v493_v11 = vrot.slane %v491_v61, 1  ;;  %v1545_v13 = vpack.c.bf16 %v297_v1, %v297_v1  ;;  %v259_v62 = vld [vmem:[%s1505_s20 + $0x60] sm:$0xff] }
  0x20   : > { %v338_v15 = vpack.c.bf16 %v298_v2, %v298_v2  ;;  %v462_v17 = vpack.c.b16 %v438_v3, %v437_v63  ;;  %v463_v19 = vpack.c.b16 %v440_v7, %v439_v4  ;;  %v1548_v20 = vpack.c.bf16 %v295_v5, %v295_v5  ;;  %v260_v63 = vld [vmem:[%s1505_s20 + $0x68] sm:$0x3]  ;;  %v261_v3 = vld [vmem:[%s1505_s20 + $0x70] sm:$0xff]  ;;  %v262_v4 = vld [vmem:[%s1505_s20 + $0x78] sm:$0x3] }
  0x21   : > { %v479_v16 = vrot.slane %v477_v9, 1  ;;  %v336_v21 = vpack.c.bf16 %v296_v6, %v296_v6  ;;  %v648_v25 = vrot.slane %v448_v54, 1  ;;  %v494_v26 = vor.u32 %v493_v11, %v489_v10 }
  0x22   : > { %673 = vrot.lane.b32.xlu1 %v650_v59, %s1464_s21  ;;  %v575_v27 = vshll.u32 %v462_v17, 16  ;;  %v417_v28 = vunpack.c.l.b16 %v1545_v13  ;;  %v418_v30 = vunpack.c.l.b16 %v338_v15  ;;  %v321_v31 = vmax.f32 %v281_v22, 0.0 }
  0x23   : > { %611 = vrot.lane.b32.xlu0 %v487_v60, %s1465_s22  ;;  %v480_v24 = vor.u32 %v479_v16, %v475_v8  ;;  %v322_v32 = vmax.f32 %v282_v23, 0.0  ;;  %v582_v33 = vshll.u32 %v463_v19, 16  ;;  %v415_v34 = vunpack.c.l.b16 %v1548_v20 }
  0x24   : > { %v416_v35 = vunpack.c.l.b16 %v336_v21  ;;  %v573_v36 = vshrl.u32 %v462_v17, 16  ;;  %v577_v37 = vrot.slane %v575_v27, 1  ;;  %v1556_v38 = vpack.c.b16 %v418_v30, %v417_v28  ;;  %v275_v27 = vld [vmem:[%s1505_s20 + $0xe0] sm:$0xff]  ;;  %v276_v28 = vld [vmem:[%s1505_s20 + $0xe8] sm:$0x3] }
  0x25   : > { %v1558_v39 = vpack.c.bf16 %v321_v31, %v321_v31  ;;  %v362_v40 = vpack.c.bf16 %v322_v32, %v322_v32  ;;  %v580_v43 = vshrl.u32 %v463_v19, 16  ;;  %v584_v44 = vrot.slane %v582_v33, 1 }
  0x26   : > { %v451_v45 = vpack.c.b16 %v416_v35, %v415_v34  ;;  %v578_v46 = vor.u32 %v577_v37, %v573_v36  ;;  %v323_v47 = vmax.f32 %v283_v41, 0.0  ;;  %v324_v48 = vmax.f32 %v284_v42, 0.0 }
  0x27   : > { %609 = vrot.lane.b32.xlu2 %v480_v24, %s1465_s22  ;;  %v662_v49 = vrot.slane %v462_v17, 1  ;;  %v505_v51 = vshll.u32 %v1556_v38, 16  ;;  %v441_v52 = vunpack.c.l.b16 %v1558_v39  ;;  %v442_v53 = vunpack.c.l.b16 %v362_v40 }
  0x28   : > { %v585_v54 = vor.u32 %v584_v44, %v580_v43  ;;  %v498_v55 = vshll.u32 %v451_v45, 16  ;;  %v1566_v57 = vpack.c.bf16 %v323_v47, %v323_v47  ;;  %v364_v58 = vpack.c.bf16 %v324_v48, %v324_v48  ;;  %v264_v47 = vld [vmem:[%s1505_s20 + $0x88] sm:$0x3] }
  0x29   : > { %v503_v59 = vshrl.u32 %v1556_v38, 16  ;;  %v507_v60 = vrot.slane %v505_v51, 1  ;;  %v1570_v61 = vpack.c.b16 %v442_v53, %v441_v52  ;;  %v496_v0 = vshrl.u32 %v451_v45, 16  ;;  %v266_v51 = vld [vmem:[%s1505_s20 + $0x98] sm:$0x3] }
  0x2a   : > { %669 = vrot.lane.b32.xlu1 %v648_v25, %s1464_s21  ;;  %v500_v1 = vrot.slane %v498_v55, 1  ;;  %v663_v2 = vrot.slane %v463_v19, 1  ;;  %v443_v5 = vunpack.c.l.b16 %v1566_v57  ;;  %v444_v6 = vunpack.c.l.b16 %v364_v58 }
  0x2b   : > { %613 = vrot.lane.b32.xlu0 %v494_v26, %s1465_s22  ;;  %v299_v7 = vmax.f32 %v259_v62, 0.0  ;;  %v300_v8 = vmax.f32 %v260_v63, 0.0  ;;  %v508_v9 = vor.u32 %v507_v60, %v503_v59  ;;  %v589_v10 = vshll.u32 %v1570_v61, 16 }
  0x2c   : > { %v501_v11 = vor.u32 %v500_v1, %v496_v0  ;;  %v301_v15 = vmax.f32 %v261_v3, 0.0  ;;  %v302_v16 = vmax.f32 %v262_v4, 0.0  ;;  %v465_v17 = vpack.c.b16 %v444_v6, %v443_v5 }
  0x2d   : > { %v1580_v21 = vpack.c.bf16 %v299_v7, %v299_v7  ;;  %v340_v19 = vpack.c.bf16 %v300_v8, %v300_v8  ;;  %v587_v22 = vshrl.u32 %v1570_v61, 16  ;;  %v591_v23 = vrot.slane %v589_v10, 1  ;;  %v273_v8 = vld [vmem:[%s1505_s20 + $0xd0] sm:$0xff] }
  0x2e   : > { %v1585_v24 = vpack.c.bf16 %v301_v15, %v301_v15  ;;  %v342_v25 = vpack.c.bf16 %v302_v16, %v302_v16  ;;  %v651_v26 = vrot.slane %v451_v45, 1  ;;  %v596_v30 = vshll.u32 %v465_v17, 16  ;;  %v271_v15 = vld [vmem:[%s1505_s20 + $0xc0] sm:$0xff]  ;;  %v272_v16 = vld [vmem:[%s1505_s20 + $0xc8] sm:$0x3] }
  0x2f   : > { %637 = vrot.lane.b32.xlu2 %v578_v46, %s1465_s22  ;;  %v419_v31 = vunpack.c.l.b16 %v1580_v21  ;;  %v420_v32 = vunpack.c.l.b16 %v340_v19  ;;  %v592_v33 = vor.u32 %v591_v23, %v587_v22  ;;  %v652_v34 = vrot.slane %v1556_v38, 1  ;;  %v263_v46 = vld [vmem:[%s1505_s20 + $0x80] sm:$0xff] }
  0x30   : > { %v315_v35 = vmax.f32 %v275_v27, 0.0  ;;  %v316_v36 = vmax.f32 %v276_v28, 0.0  ;;  %v421_v37 = vunpack.c.l.b16 %v1585_v24  ;;  %v422_v40 = vunpack.c.l.b16 %v342_v25 }
  0x31   : > { %v594_v41 = vshrl.u32 %v465_v17, 16  ;;  %v598_v42 = vrot.slane %v596_v30, 1  ;;  %v453_v43 = vpack.c.b16 %v420_v32, %v419_v31  ;;  %v665_v53 = vrot.slane %v465_v17, 1 }
  0x32   : > { %697 = vrot.lane.b32.xlu1 %v662_v49, %s1464_s21  ;;  %v1594_v44 = vpack.c.bf16 %v315_v35, %v315_v35  ;;  %v356_v45 = vpack.c.bf16 %v316_v36, %v316_v36  ;;  %v1599_v38 = vpack.c.b16 %v422_v40, %v421_v37  ;;  %v265_v49 = vld [vmem:[%s1505_s20 + $0x90] sm:$0xff]  ;;  %v304_v55 = vmax.f32 %v264_v47, 0.0 }
  0x33   : > { %639 = vrot.lane.b32.xlu0 %v585_v54, %s1465_s22  ;;  %v599_v48 = vor.u32 %v598_v42, %v594_v41  ;;  %v512_v52 = vshll.u32 %v453_v43, 16  ;;  %v303_v54 = vmax.f32 %v263_v46, 0.0  ;;  %v305_v60 = vmax.f32 %v265_v49, 0.0  ;;  %v267_v41 = vld [vmem:[%s1505_s20 + $0xa0] sm:$0xff]  ;;  %v268_v42 = vld [vmem:[%s1505_s20 + $0xa8] sm:$0x3] }
  0x34   : > { %v435_v58 = vunpack.c.l.b16 %v1594_v44  ;;  %v436_v59 = vunpack.c.l.b16 %v356_v45  ;;  %v306_v62 = vmax.f32 %v266_v51, 0.0  ;;  %v664_v63 = vrot.slane %v1570_v61, 1 }
  0x35   : > { %v519_v0 = vshll.u32 %v1599_v38, 16  ;;  %v510_v1 = vshrl.u32 %v453_v43, 16  ;;  %v1607_v3 = vpack.c.bf16 %v303_v54, %v303_v54  ;;  %v344_v4 = vpack.c.bf16 %v304_v55, %v304_v55 }
  0x36   : > { %v461_v5 = vpack.c.b16 %v436_v59, %v435_v58  ;;  %v1610_v6 = vpack.c.bf16 %v305_v60, %v305_v60  ;;  %v346_v7 = vpack.c.bf16 %v306_v62, %v306_v62  ;;  %v517_v61 = vshrl.u32 %v1599_v38, 16 }
  0x37   : > { %699 = vrot.lane.b32.xlu2 %v663_v2, %s1464_s21  ;;  %v514_v2 = vrot.slane %v512_v52, 1  ;;  %v521_v10 = vrot.slane %v519_v0, 1  ;;  %v423_v17 = vunpack.c.l.b16 %v1607_v3  ;;  %v424_v19 = vunpack.c.l.b16 %v344_v4 }
  0x38   : > { %v313_v22 = vmax.f32 %v273_v8, 0.0  ;;  %v653_v25 = vrot.slane %v453_v43, 1  ;;  %v425_v27 = vunpack.c.l.b16 %v1610_v6  ;;  %v426_v28 = vunpack.c.l.b16 %v346_v7  ;;  %v269_v7 = vld [vmem:[%s1505_s20 + $0xb0] sm:$0xff]  ;;  %v270_v8 = vld [vmem:[%s1505_s20 + $0xb8] sm:$0x3] }
  0x39   : > { %v522_v30 = vor.u32 %v521_v10, %v517_v61  ;;  %v311_v31 = vmax.f32 %v271_v15, 0.0  ;;  %v312_v32 = vmax.f32 %v272_v16, 0.0  ;;  %v566_v36 = vshrl.u32 %v461_v5, 16 }
  0x3a   : > { %617 = vrot.lane.b32.xlu1 %v508_v9, %s1465_s22  ;;  %v274_v9 = vld [vmem:[%s1505_s20 + $0xd8] sm:$0x3]  ;;  %v456_v40 = vpack.c.b16 %v426_v28, %v425_v27  ;;  %v654_v46 = vrot.slane %v1599_v38, 1  ;;  %v307_v51 = vmax.f32 %v267_v41, 0.0  ;;  %v308_v52 = vmax.f32 %v268_v42, 0.0 }
  0x3b   : > { %615 = vrot.lane.b32.xlu0 %v501_v11, %s1465_s22  ;;  %v515_v11 = vor.u32 %v514_v2, %v510_v1  ;;  %v314_v23 = vmax.f32 %v274_v9, 0.0  ;;  %v1627_v43 = vpack.c.bf16 %v311_v31, %v311_v31  ;;  %v352_v45 = vpack.c.bf16 %v312_v32, %v312_v32  ;;  %v285_v32 = vld [vmem:[%s1505_s20 + $0x130] sm:$0xff] }
  0x3c   : > { %v533_v55 = vshll.u32 %v456_v40, 16  ;;  %v1633_v38 = vpack.c.bf16 %v307_v51, %v307_v51  ;;  %v348_v0 = vpack.c.bf16 %v308_v52, %v308_v52  ;;  %v531_v1 = vshrl.u32 %v456_v40, 16 }
  0x3d   : > { %v354_v35 = vpack.c.bf16 %v314_v23, %v314_v23  ;;  %v431_v58 = vunpack.c.l.b16 %v1627_v43  ;;  %v432_v59 = vunpack.c.l.b16 %v352_v45  ;;  %v309_v15 = vmax.f32 %v269_v7, 0.0 }
  0x3e   : > { %v535_v2 = vrot.slane %v533_v55, 1  ;;  %v427_v61 = vunpack.c.l.b16 %v1633_v38  ;;  %v428_v10 = vunpack.c.l.b16 %v348_v0  ;;  %v310_v16 = vmax.f32 %v270_v8, 0.0 }
  0x3f   : > { %675 = vrot.lane.b32.xlu2 %v651_v26, %s1464_s21  ;;  %v568_v26 = vshll.u32 %v461_v5, 16  ;;  %v434_v49 = vunpack.c.l.b16 %v354_v35  ;;  %v459_v4 = vpack.c.b16 %v432_v59, %v431_v58  ;;  %v656_v31 = vrot.slane %v456_v40, 1 }
  0x40   : > { %v350_v27 = vpack.c.bf16 %v310_v16, %v310_v16  ;;  %v325_v42 = vmax.f32 %v285_v32, 0.0  ;;  %v1436_v16 = vld [vmem:[%s234_s26] sm:$0x30] }
  0x41   : > { %v570_v37 = vrot.slane %v568_v26, 1  ;;  %v1642_v26 = vpack.c.bf16 %v309_v15, %v309_v15  ;;  %v552_v28 = vshrl.u32 %v459_v4, 16  ;;  %v659_v52 = vrot.slane %v459_v4, 1 }
  0x42   : > { %641 = vrot.lane.b32.xlu1 %v592_v33, %s1465_s22  ;;  %v455_v33 = vpack.c.b16 %v424_v19, %v423_v17  ;;  %v536_v17 = vor.u32 %v535_v2, %v531_v1  ;;  %v554_v19 = vshll.u32 %v459_v4, 16  ;;  %v430_v41 = vunpack.c.l.b16 %v350_v27 }
  0x43   : > { %677 = vrot.lane.b32.xlu0 %v652_v34, %s1464_s21  ;;  %v1621_v34 = vpack.c.bf16 %v313_v22, %v313_v22  ;;  %v571_v54 = vor.u32 %v570_v37, %v566_v36  ;;  %v429_v37 = vunpack.c.l.b16 %v1642_v26  ;;  %v1650_v51 = vpack.c.bf16 %v325_v42, %v325_v42 }
  0x44   : > { %v526_v47 = vshll.u32 %v455_v33, 16  ;;  %v524_v60 = vshrl.u32 %v455_v33, 16 }
  0x45   : > { %v445_v55 = vunpack.c.l.b16 %v1650_v51 }
  0x46   : > { %v528_v62 = vrot.slane %v526_v47, 1 }
  0x47   : > { %643 = vrot.lane.b32.xlu2 %v599_v48, %s1465_s22  ;;  %v433_v48 = vunpack.c.l.b16 %v1621_v34 }
  0x4a   : > { %703 = vrot.lane.b32.xlu1 %v665_v53, %s1464_s21  ;;  %v661_v53 = vrot.slane %v461_v5, 1  ;;  %v529_v5 = vor.u32 %v528_v62, %v524_v60 }
  0x4b   : > { %701 = vrot.lane.b32.xlu0 %v664_v63, %s1464_s21  ;;  %v460_v63 = vpack.c.b16 %v434_v49, %v433_v48  ;;  %v458_v49 = vpack.c.b16 %v430_v41, %v429_v37 }
  0x4d   : > { %v561_v9 = vshll.u32 %v460_v63, 16  ;;  %v559_v22 = vshrl.u32 %v460_v63, 16  ;;  %v660_v59 = vrot.slane %v460_v63, 1  ;;  %v545_v60 = vshrl.u32 %v458_v49, 16 }
  0x4f   : > { %619 = vrot.lane.b32.xlu2 %v515_v11, %s1465_s22  ;;  %v655_v11 = vrot.slane %v455_v33, 1  ;;  %v563_v23 = vrot.slane %v561_v9, 1  ;;  %v286_v33 = vld [vmem:[%s1505_s20 + $0x138] sm:$0x3] }
  0x50   : > { %v326_v45 = vmax.f32 %v286_v33, 0.0 }
  0x51   : > { %v564_v35 = vor.u32 %v563_v23, %v559_v22 }
  0x52   : > { %679 = vrot.lane.b32.xlu1 %v653_v25, %s1464_s21  ;;  %v457_v25 = vpack.c.b16 %v428_v10, %v427_v61  ;;  %v366_v40 = vpack.c.bf16 %v326_v45, %v326_v45  ;;  %v1397_v61 = vld [vmem:[%s234_s26 + $0x8] sm:$0xf]  ;;  %v1437_v10 = vld [vmem:[%s234_s26 + $0x8] sm:$0x30] }
  0x53   : > { %621 = vrot.lane.b32.xlu0 %v522_v30, %s1465_s22  ;;  %v556_v30 = vrot.slane %v554_v19, 1  ;;  %v1398_v15 = vor.u32 %v1437_v10, %v1397_v61  ;;  %v1438_v19 = vld [vmem:[%s234_s26 + $0x10] sm:$0x30] }
  0x54   : > { %v540_v36 = vshll.u32 %v457_v25, 16  ;;  %v538_v47 = vshrl.u32 %v457_v25, 16  ;;  %v446_v58 = vunpack.c.l.b16 %v366_v40  ;;  %v657_v4 = vrot.slane %v457_v25, 1 }
  0x55   : > { %v886_v27 = vsel %vm884_vm0, %v1398_v15, 0 }
  0x56   : > { %v542_v48 = vrot.slane %v540_v36, 1  ;;  %v466_v0 = vpack.c.b16 %v446_v58, %v445_v55  ;;  %895 = vmatpush.bf16.msra.mxu0 %v886_v27  ;;  %1439 = vmatpush.bf16.msra.mxu3 %v886_v27 }
  0x57   : > { %681 = vrot.lane.b32.xlu2 %v654_v46, %s1464_s21  ;;  %v557_v46 = vor.u32 %v556_v30, %v552_v28 }
  0x58   : > { %v603_v2 = vshll.u32 %v466_v0, 16  ;;  %v601_v7 = vshrl.u32 %v466_v0, 16  ;;  %v666_v25 = vrot.slane %v466_v0, 1 }
  0x5a   : > { %695 = vrot.lane.b32.xlu1 %v661_v53, %s1464_s21  ;;  %v547_v53 = vshll.u32 %v458_v49, 16  ;;  %v605_v8 = vrot.slane %v603_v2, 1 }
  0x5b   : > { %635 = vrot.lane.b32.xlu0 %v571_v54, %s1465_s22  ;;  %v543_v54 = vor.u32 %v542_v48, %v538_v47 }
  0x5c   : > { %v549_v62 = vrot.slane %v547_v53, 1  ;;  %v606_v63 = vor.u32 %v605_v8, %v601_v7 }
  0x5e   : > { %v550_v1 = vor.u32 %v549_v62, %v545_v60 }
  0x5f   : > { %623 = vrot.lane.b32.xlu2 %v529_v5, %s1465_s22  ;;  %v658_v5 = vrot.slane %v458_v49, 1 }
  0x62   : > { %683 = vrot.lane.b32.xlu1 %v655_v11, %s1464_s21  ;;  %v1409_v11 = vld [vmem:[%s234_s26] sm:$0xf] }
  0x63   : > { %625 = vrot.lane.b32.xlu0 %v536_v17, %s1465_s22  ;;  %v1423_v17 = vld [vmem:[%s234_s26 + $0x10] sm:$0xf]  ;;  %v1410_v22 = vor.u32 %v1436_v16, %v1409_v11 }
  0x64   : > { %v1424_v23 = vor.u32 %v1438_v19, %v1423_v17 }
  0x65   : > { %v979_v28 = vsel %vm884_vm0, %v1410_v22, 0 }
  0x66   : > { %v1051_v30 = vsel %vm884_vm0, %v1424_v23, 0  ;;  %988 = vmatpush.bf16.msra.mxu1 %v979_v28  ;;  %1440 = vmatpush.bf16.msrb.mxu3 %v979_v28 }
  0x67   : > { %685 = vrot.lane.b32.xlu2 %v656_v31, %s1464_s21  ;;  %1060 = vmatpush.bf16.msra.mxu2 %v1051_v30 }
  0x6a   : > { %633 = vrot.lane.b32.xlu1 %v564_v35, %s1465_s22 }
  0x6b   : > { %631 = vrot.lane.b32.xlu0 %v557_v46, %s1465_s22 }
  0x6f   : > { %691 = vrot.lane.b32.xlu2 %v659_v52, %s1464_s21 }
  0x72   : > { %627 = vrot.lane.b32.xlu1 %v543_v54, %s1465_s22 }
  0x73   : > { %693 = vrot.lane.b32.xlu0 %v660_v59, %s1464_s21 }
  0x77   : > { %629 = vrot.lane.b32.xlu2 %v550_v1, %s1465_s22 }
  0x79   : > { %v608_v9 = vpop.permute.xlu2 %607 }
  0x7a   : > { %689 = vrot.lane.b32.xlu1 %v658_v5, %s1464_s21  ;;  %v710_v41 = vsel %vm707_vm1, %v1516_v14, %v608_v9 }
  0x7b   : > { %687 = vrot.lane.b32.xlu0 %v657_v4, %s1464_s21 }
  0x7f   : > { %645 = vrot.lane.b32.xlu2 %v606_v63, %s1465_s22 }
  0x81   : > { %v610_v31 = vpop.permute.xlu2 %609 }
  0x82   : > { %v713_v48 = vsel %vm707_vm1, %v1526_v29, %v610_v31 }
  0x83   : > { %705 = vrot.lane.b32.xlu0 %v666_v25, %s1464_s21 }
  0x89   : > { %v638_v35 = vpop.permute.xlu2 %637 }
  0x8a   : > { %v755_v0 = vsel %vm707_vm1, %v1533_v50, %v638_v35 }
  0x8c   : > { %v672_v32 = vpop.permute.xlu1 %671 }
  0x8d   : > { %v668_v33 = vpop.permute.xlu0 %667 }
  0x8e   : > { %v770_v46 = vsel %vm768_vm2, %v710_v41, %v668_v33 }
  0x8f   : > { %v939_v53 = vunpack.c.l.b16 %v770_v46 }
  0x91   : > { %v700_v45 = vpop.permute.xlu2 %699 }
  0x94   : > { %v674_v36 = vpop.permute.xlu1 %673 }
  0x95   : > { %v612_v37 = vpop.permute.xlu0 %611 }
  0x96   : > { %v716_v42 = vsel %vm707_vm1, %v1514_v12, %v612_v37 }
  0x97   : > { %v774_v47 = vsel %vm768_vm2, %v716_v42, %v672_v32 }
  0x98   : > { %v831_v54 = vunpack.c.l.b16 %v774_v47 }
  0x99   : > { %v676_v62 = vpop.permute.xlu2 %675 }
  0x9c   : > { %v670_v49 = vpop.permute.xlu1 %669 }
  0x9d   : > { %v772_v40 = vsel %vm768_vm2, %v713_v48, %v670_v49  ;;  %v614_v52 = vpop.permute.xlu0 %613 }
  0x9e   : > { %v830_v55 = vunpack.c.l.b16 %v772_v40  ;;  %v719_v14 = vsel %vm707_vm1, %v1519_v18, %v614_v52 }
  0x9f   : > { %v776_v12 = vsel %vm768_vm2, %v719_v14, %v674_v36 }
  0xa0   : > { %v832_v58 = vunpack.c.l.b16 %v776_v12  ;;  %v846_v59 = vpack.c.b16 %v831_v54, %v830_v55  ;;  %v941_v60 = vpack.c.b16 %v830_v55, %v939_v53 }
  0xa1   : > { %v644_v9 = vpop.permute.xlu2 %643 }
  0xa2   : > { %1399 = vmatmul.msk.bf16.vlgmr.msra.gmra.mxu0 %vm859_vm3, %v846_v59  ;;  %1411 = vmatmul.msk.bf16.vlgmr.msra.gmra.mxu1 %vm859_vm3, %v941_v60  ;;  %v942_v29 = vpack.c.b16 %v832_v58, %v831_v54 }
  0xa4   : > { %1425 = vmatmul.msk.bf16.vlgmr.msra.gmra.mxu2 %vm859_vm3, %v942_v29  ;;  %v698_v1 = vpop.permute.xlu1 %697 }
  0xa5   : > { %v800_v18 = vsel %vm768_vm2, %v755_v0, %v698_v1  ;;  %v640_v2 = vpop.permute.xlu0 %639 }
  0xa6   : > { %v842_v5 = vunpack.c.l.b16 %v800_v18  ;;  %v758_v4 = vsel %vm707_vm1, %v1537_v56, %v640_v2 }
  0xa7   : > { %v1687_v7 = vsel %vm768_vm2, %v758_v4, %v700_v45 }
  0xa8   : > { %v843_v8 = vunpack.c.l.b16 %v1687_v7 }
  0xa9   : > { %v620_v23 = vpop.permute.xlu2 %619 }
  0xaa   : > { %v852_v63 = vpack.c.b16 %v843_v8, %v842_v5 }
  0xac   : > { %1405 = vmatmul.msk.bf16.vlgmr.msra.gmra.mxu3 %vm859_vm3, %v852_v63  ;;  %v618_v50 = vpop.permute.xlu1 %617 }
  0xad   : > { %v616_v61 = vpop.permute.xlu0 %615  ;;  %1441 = vmatpush.bf16.msra.mxu3 %v1051_v30  ;;  %v725_v17 = vsel %vm707_vm1, %v1545_v13, %v618_v50 }
  0xae   : > { %v722_v10 = vsel %vm707_vm1, %v1548_v20, %v616_v61  ;;  %v764_v20 = vsel %vm707_vm1, %v1566_v57, %v644_v9 }
  0xaf   : > { %v778_v11 = vsel %vm768_vm2, %v722_v10, %v676_v62 }
  0xb0   : > { %v833_v56 = vunpack.c.l.b16 %v778_v11 }
  0xb1   : > { %v682_v36 = vpop.permute.xlu2 %681 }
  0xb2   : > { %1412 = vmatmul.msk.bf16.gmra.mxu1 %vm859_vm3, %v942_v29  ;;  %v847_v15 = vpack.c.b16 %v833_v56, %v832_v58 }
  0xb4   : > { %1400 = vmatmul.msk.bf16.gmra.mxu0 %vm859_vm3, %v847_v15  ;;  %v642_v16 = vpop.permute.xlu1 %641 }
  0xb5   : > { %v678_v19 = vpop.permute.xlu0 %677  ;;  %v761_v30 = vsel %vm707_vm1, %v1558_v39, %v642_v16  ;;  %v728_v39 = vsel %vm707_vm1, %v1580_v21, %v620_v23 }
  0xb6   : > { %v780_v22 = vsel %vm768_vm2, %v725_v17, %v678_v19 }
  0xb7   : > { %v834_v25 = vunpack.c.l.b16 %v780_v22 }
  0xb9   : > { %v943_v27 = vpack.c.b16 %v834_v25, %v833_v56  ;;  %v624_v52 = vpop.permute.xlu2 %623 }
  0xbb   : > { %1426 = vmatmul.msk.bf16.gmra.mxu2 %vm859_vm3, %v943_v27 }
  0xbc   : > { %v704_v28 = vpop.permute.xlu1 %703 }
  0xbd   : > { %v1707_v31 = vsel %vm768_vm2, %v764_v20, %v704_v28  ;;  %v702_v32 = vpop.permute.xlu0 %701 }
  0xbe   : > { %v845_v13 = vunpack.c.l.b16 %v1707_v31  ;;  %v804_v33 = vsel %vm768_vm2, %v761_v30, %v702_v32 }
  0xbf   : > { %v844_v35 = vunpack.c.l.b16 %v804_v33 }
  0xc1   : > { %v853_v37 = vpack.c.b16 %v845_v13, %v844_v35  ;;  %v686_v59 = vpop.permute.xlu2 %685  ;;  %v948_v50 = vpack.c.b16 %v844_v35, %v843_v8 }
  0xc2   : > { %1413 = vmatmul.msk.bf16.gmra.mxu1 %vm859_vm3, %v943_v27 }
  0xc3   : > { %1406 = vmatmul.msk.bf16.gmra.mxu3 %vm859_vm3, %v853_v37 }
  0xc4   : > { %v680_v57 = vpop.permute.xlu1 %679 }
  0xc5   : > { %v782_v41 = vsel %vm768_vm2, %v728_v39, %v680_v57  ;;  %v622_v42 = vpop.permute.xlu0 %621 }
  0xc6   : > { %v835_v45 = vunpack.c.l.b16 %v782_v41  ;;  %v731_v46 = vsel %vm707_vm1, %v1585_v24, %v622_v42  ;;  %v734_v24 = vsel %vm707_vm1, %v1607_v3, %v624_v52 }
  0xc7   : > { %v784_v47 = vsel %vm768_vm2, %v731_v46, %v682_v36 }
  0xc8   : > { %v836_v48 = vunpack.c.l.b16 %v784_v47  ;;  %v848_v49 = vpack.c.b16 %v835_v45, %v834_v25 }
  0xc9   : > { %v692_v4 = vpop.permute.xlu2 %691 }
  0xca   : > { %1401 = vmatmul.msk.bf16.gmra.mxu0 %vm859_vm3, %v848_v49  ;;  %v944_v40 = vpack.c.b16 %v836_v48, %v835_v45 }
  0xcc   : > { %1427 = vmatmul.msk.bf16.gmra.mxu2 %vm859_vm3, %v944_v40  ;;  %v696_v53 = vpop.permute.xlu1 %695 }
  0xcd   : > { %v636_v21 = vpop.permute.xlu0 %635 }
  0xce   : > { %v752_v54 = vsel %vm707_vm1, %v1594_v44, %v636_v21 }
  0xcf   : > { %v798_v55 = vsel %vm768_vm2, %v752_v54, %v696_v53 }
  0xd0   : > { %v841_v14 = vunpack.c.l.b16 %v798_v55 }
  0xd1   : > { %v630_v16 = vpop.permute.xlu2 %629 }
  0xd2   : > { %v947_v12 = vpack.c.b16 %v842_v5, %v841_v14  ;;  %1414 = vmatmul.msk.bf16.gmra.mxu1 %vm859_vm3, %v944_v40 }
  0xd4   : > { %1417 = vmatmul.msk.bf16.vlgmr.msrb.gmra.mxu3 %vm859_vm3, %v947_v12  ;;  %v684_v58 = vpop.permute.xlu1 %683 }
  0xd5   : > { %v786_v60 = vsel %vm768_vm2, %v734_v24, %v684_v58  ;;  %v626_v29 = vpop.permute.xlu0 %625 }
  0xd6   : > { %v837_v62 = vunpack.c.l.b16 %v786_v60  ;;  %v737_v44 = vsel %vm707_vm1, %v1610_v6, %v626_v29 }
  0xd7   : > { %v788_v0 = vsel %vm768_vm2, %v737_v44, %v686_v59 }
  0xd8   : > { %v1035_v1 = vunpack.c.l.b16 %v788_v0  ;;  %v849_v18 = vpack.c.b16 %v837_v62, %v836_v48 }
  0xda   : > { %1402 = vmatmul.msk.bf16.gmra.mxu0 %vm859_vm3, %v849_v18  ;;  %v1037_v2 = vpack.c.b16 %v1035_v1, %v837_v62 }
  0xdc   : > { %1428 = vmatmul.msk.bf16.gmra.mxu2 %vm859_vm3, %v1037_v2  ;;  %v634_v3 = vpop.permute.xlu1 %633 }
  0xdd   : > { %v632_v5 = vpop.permute.xlu0 %631  ;;  %v749_v61 = vsel %vm707_vm1, %v1621_v34, %v634_v3 }
  0xde   : > { %v746_v63 = vsel %vm707_vm1, %v1627_v43, %v632_v5  ;;  %v743_v43 = vsel %vm707_vm1, %v1642_v26, %v630_v16  ;;  %v646_v26 = vpop.permute.xlu2 %645 }
  0xdf   : > { %v794_v6 = vsel %vm768_vm2, %v746_v63, %v692_v4  ;;  %v767_v28 = vsel %vm707_vm1, %v1650_v51, %v646_v26 }
  0xe0   : > { %v839_v56 = vunpack.c.l.b16 %v794_v6 }
  0xe4   : > { %1418 = vmatmul.msk.bf16.gmra.mxu3 %vm859_vm3, %v948_v50  ;;  %v628_v9 = vpop.permute.xlu1 %627 }
  0xe5   : > { %v694_v10 = vpop.permute.xlu0 %693  ;;  %v740_v8 = vsel %vm707_vm1, %v1633_v38, %v628_v9 }
  0xe6   : > { %v796_v11 = vsel %vm768_vm2, %v749_v61, %v694_v10 }
  0xe7   : > { %v840_v15 = vunpack.c.l.b16 %v796_v11 }
  0xe9   : > { %v946_v17 = vpack.c.b16 %v840_v15, %v839_v56  ;;  %v851_v33 = vpack.c.b16 %v841_v14, %v840_v15 }
  0xec   : > { %1429 = vmatmul.msk.bf16.gmra.mxu2 %vm859_vm3, %v946_v17  ;;  %v690_v7 = vpop.permute.xlu1 %689 }
  0xed   : > { %v792_v19 = vsel %vm768_vm2, %v743_v43, %v690_v7  ;;  %v688_v22 = vpop.permute.xlu0 %687 }
  0xee   : > { %v838_v34 = vunpack.c.l.b16 %v792_v19  ;;  %v790_v23 = vsel %vm768_vm2, %v740_v8, %v688_v22 }
  0xef   : > { %v940_v25 = vunpack.c.l.b16 %v790_v23 }
  0xf0   : > { %v850_v27 = vpack.c.b16 %v839_v56, %v838_v34 }
  0xf1   : > { %v945_v20 = vpack.c.b16 %v838_v34, %v940_v25 }
  0xf2   : > { %1403 = vmatmul.msk.bf16.gmra.mxu0 %vm859_vm3, %v850_v27 }
  0xf3   : > { %1415 = vmatmul.msk.bf16.gmra.mxu1 %vm859_vm3, %v945_v20 }
  0xf4   : > { %1431 = vmatmul.msk.bf16.vlgmr.msra.gmra.mxu3 %vm859_vm3, %v948_v50 }
  0xf5   : > { %v706_v38 = vpop.permute.xlu0 %705 }
  0xf6   : > { %v808_v30 = vsel %vm768_vm2, %v767_v28, %v706_v38 }
  0xf7   : > { %v1036_v32 = vunpack.c.l.b16 %v808_v30 }
  0xf9   : > { %v1038_v35 = vpack.c.b16 %v1036_v32, %v845_v13 }
  0xfc   : > { %1430 = vmatmul.msk.bf16.gmra.mxu2 %vm859_vm3, %v947_v12 }
 0x102   : > { %1404 = vmatmul.msk.bf16.gmra.mxu0 %vm859_vm3, %v851_v33 }
 0x103   : > { %1416 = vmatmul.msk.bf16.gmra.mxu1 %vm859_vm3, %v946_v17 }
 0x104   : > { %1432 = vmatmul.msk.bf16.gmra.mxu3 %vm859_vm3, %v1038_v35 }
 0x11f   : > { %v897_v36 = vpop.f32.mrf.mxu0  ;;  %v990_v37 = vpop.f32.mrf.mxu1 }
 0x120   : > { %v991_v39 = vadd.f32 %v990_v37, %v897_v36 }
 0x127   : > { %v1062_v51 = vpop.f32.mrf.mxu2  ;;  %v992_v41 = vpop.f32.mrf.mxu1 }
 0x128   : > { %v1764_v57 = vadd.f32 %v1062_v51, %v991_v39  ;;  %v899_v42 = vpop.f32.mrf.mxu0 }
 0x129   : > { %v993_v3 = vadd.f32 %v992_v41, %v899_v42 }
 0x12a   : > { %v1156_v16 = vmul.f32 %v1764_v57, %v1764_v57  ;;  %v1118_v34 = vsel %vm707_vm1, %v1764_v57, 0.0 }
 0x12c   : > { %v1172_v30 = vsel %vm707_vm1, %v1156_v16, 0.0 }
 0x12f   : > { %v1766_v45 = vpop.f32.mrf.mxu3  ;;  %v1064_v46 = vpop.f32.mrf.mxu2 }
 0x130   : > { %v995_v47 = vpop.f32.mrf.mxu1  ;;  %v1782_v9 = vadd.f32 %v1064_v46, %v993_v3 }
 0x131   : > { %v902_v48 = vpop.f32.mrf.mxu0 }
 0x132   : > { %v996_v63 = vadd.f32 %v995_v47, %v902_v48  ;;  %v1157_v11 = vmul.f32 %v1782_v9, %v1782_v9  ;;  %v1119_v7 = vsel %vm707_vm1, %v1782_v9, 0.0 }
 0x133   : > { %v1120_v32 = vadd.f32 %v1119_v7, %v1118_v34 }
 0x134   : > { %v1173_v20 = vsel %vm707_vm1, %v1157_v11, 0.0 }
 0x135   : > { %v1174_v41 = vadd.f32 %v1173_v20, %v1172_v30 }
 0x137   : > { %v1768_v49 = vpop.f32.mrf.mxu3 }
 0x138   : > { %v997_v13 = vpop.f32.mrf.mxu1 }
 0x139   : > { %v904_v40 = vpop.f32.mrf.mxu0 }
 0x13a   : > { %v998_v10 = vadd.f32 %v997_v13, %v904_v40 }
 0x13e   : > { %v1067_v31 = vpop.f32.mrf.mxu2 }
 0x13f   : > { %v1784_v61 = vadd.f32 %v1067_v31, %v996_v63 }
 0x140   : > { %v1000_v21 = vpop.f32.mrf.mxu1 }
 0x141   : > { %v1158_v17 = vmul.f32 %v1784_v61, %v1784_v61  ;;  %v1121_v26 = vsel %vm707_vm1, %v1784_v61, 0.0 }
 0x142   : > { %v1122_v42 = vadd.f32 %v1121_v26, %v1120_v32 }
 0x143   : > { %v1175_v33 = vsel %vm707_vm1, %v1158_v17, 0.0 }
 0x144   : > { %v1176_v40 = vadd.f32 %v1175_v33, %v1174_v41 }
 0x146   : > { %v1770_v52 = vpop.f32.mrf.mxu3  ;;  %v1069_v53 = vpop.f32.mrf.mxu2 }
 0x147   : > { %v907_v54 = vpop.f32.mrf.mxu0  ;;  %v1788_v56 = vadd.f32 %v1069_v53, %v998_v10 }
 0x148   : > { %v1002_v12 = vpop.f32.mrf.mxu1  ;;  %v1001_v15 = vadd.f32 %v1000_v21, %v907_v54 }
 0x149   : > { %v1159_v28 = vmul.f32 %v1788_v56, %v1788_v56  ;;  %v1123_v35 = vsel %vm707_vm1, %v1788_v56, 0.0 }
 0x14a   : > { %v1124_v53 = vadd.f32 %v1123_v35, %v1122_v42 }
 0x14b   : > { %v1177_v47 = vsel %vm707_vm1, %v1159_v28, 0.0 }
 0x14e   : > { %v1772_v55 = vpop.f32.mrf.mxu3 }
 0x14f   : > { %v1072_v14 = vpop.f32.mrf.mxu2  ;;  %v909_v24 = vpop.f32.mrf.mxu0 }
 0x150   : > { %v1005_v60 = vpop.f32.mrf.mxu1  ;;  %v1003_v43 = vadd.f32 %v1002_v12, %v909_v24  ;;  %v1796_v8 = vadd.f32 %v1072_v14, %v1001_v15 }
 0x152   : > { %v1160_v36 = vmul.f32 %v1796_v8, %v1796_v8  ;;  %v1125_v48 = vsel %vm707_vm1, %v1796_v8, 0.0 }
 0x154   : > { %v1179_v21 = vsel %vm707_vm1, %v1160_v36, 0.0 }
 0x157   : > { %v1774_v58 = vpop.f32.mrf.mxu3  ;;  %v1074_v59 = vpop.f32.mrf.mxu2 }
 0x158   : > { %v912_v29 = vpop.f32.mrf.mxu0  ;;  %v1007_v18 = vpop.f32.mrf.mxu1  ;;  %v1802_v23 = vadd.f32 %v1074_v59, %v1003_v43  ;;  %v1021_v20 = vadd.f32 %v1774_v58, %v1766_v45 }
 0x159   : > { %v1006_v38 = vadd.f32 %v1005_v60, %v912_v29  ;;  %v1178_v60 = vadd.f32 %v1177_v47, %v1176_v40  ;;  %v1126_v29 = vadd.f32 %v1125_v48, %v1124_v53 }
 0x15a   : > { %v1161_v46 = vmul.f32 %v1802_v23, %v1802_v23  ;;  %v1127_v54 = vsel %vm707_vm1, %v1802_v23, 0.0 }
 0x15f   : > { %v1776_v62 = vpop.f32.mrf.mxu3  ;;  %v1077_v44 = vpop.f32.mrf.mxu2 }
 0x160   : > { %v914_v2 = vpop.f32.mrf.mxu0  ;;  %v1815_v37 = vadd.f32 %v1077_v44, %v1006_v38  ;;  %v1181_v44 = vsel %vm707_vm1, %v1161_v46, 0.0  ;;  %v1023_v32 = vadd.f32 %v1776_v62, %v1768_v49 }
 0x161   : > { %v1008_v39 = vadd.f32 %v1007_v18, %v914_v2 }
 0x162   : > { %v1162_v14 = vmul.f32 %v1815_v37, %v1815_v37  ;;  %v1129_v2 = vsel %vm707_vm1, %v1815_v37, 0.0 }
 0x164   : > { %v1183_v10 = vsel %vm707_vm1, %v1162_v14, 0.0 }
 0x167   : > { %v1778_v0 = vpop.f32.mrf.mxu3  ;;  %v1079_v1 = vpop.f32.mrf.mxu2 }
 0x168   : > { %v1822_v31 = vadd.f32 %v1079_v1, %v1008_v39  ;;  %v1026_v48 = vadd.f32 %v1778_v0, %v1770_v52 }
 0x16a   : > { %v1163_v3 = vmul.f32 %v1822_v31, %v1822_v31  ;;  %v1131_v11 = vsel %vm707_vm1, %v1822_v31, 0.0 }
 0x16c   : > { %v1185_v7 = vsel %vm707_vm1, %v1163_v3, 0.0 }
 0x16f   : > { %v1780_v5 = vpop.f32.mrf.mxu3  ;;  %v1082_v4 = vpop.f32.mrf.mxu2 }
 0x170   : > { %v917_v50 = vpop.f32.mrf.mxu0  ;;  %v1010_v6 = vpop.f32.mrf.mxu1  ;;  %v1028_v52 = vadd.f32 %v1780_v5, %v1772_v55 }
 0x171   : > { %v1011_v51 = vadd.f32 %v1010_v6, %v917_v50  ;;  %v1180_v6 = vadd.f32 %v1179_v21, %v1178_v60 }
 0x173   : > { %v1829_v12 = vadd.f32 %v1082_v4, %v1011_v51  ;;  %v1128_v4 = vadd.f32 %v1127_v54, %v1126_v29  ;;  %v1182_v17 = vadd.f32 %v1181_v44, %v1180_v6 }
 0x175   : > { %v1164_v15 = vmul.f32 %v1829_v12, %v1829_v12  ;;  %v1130_v43 = vadd.f32 %v1129_v2, %v1128_v4 }
 0x177   : > { %v1084_v19 = vpop.f32.mrf.mxu2  ;;  %v1798_v22 = vpop.f32.mrf.mxu3  ;;  %v1187_v26 = vsel %vm707_vm1, %v1164_v15, 0.0 }
 0x178   : > { %v919_v25 = vpop.f32.mrf.mxu0  ;;  %v1012_v27 = vpop.f32.mrf.mxu1  ;;  %v1860_v51 = vadd.f32 %v1798_v22, %v1021_v20 }
 0x179   : > { %v1013_v13 = vadd.f32 %v1012_v27, %v919_v25  ;;  %v1184_v25 = vadd.f32 %v1183_v10, %v1182_v17  ;;  %v1132_v27 = vadd.f32 %v1131_v11, %v1130_v43 }
 0x17a   : > { %v1168_v53 = vmul.f32 %v1860_v51, %v1860_v51 }
 0x17b   : > { %v1836_v63 = vadd.f32 %v1084_v19, %v1013_v13  ;;  %v1133_v19 = vsel %vm707_vm1, %v1829_v12, 0.0  ;;  %v1186_v33 = vadd.f32 %v1185_v7, %v1184_v25 }
 0x17c   : > { %v1134_v35 = vadd.f32 %v1133_v19, %v1132_v27  ;;  %v1195_v3 = vsel %vm707_vm1, %v1168_v53, 0.0 }
 0x17d   : > { %v1165_v34 = vmul.f32 %v1836_v63, %v1836_v63  ;;  %v1135_v28 = vsel %vm707_vm1, %v1836_v63, 0.0  ;;  %v1188_v42 = vadd.f32 %v1187_v26, %v1186_v33 }
 0x17e   : > { %v1136_v46 = vadd.f32 %v1135_v28, %v1134_v35 }
 0x17f   : > { %v1087_v24 = vpop.f32.mrf.mxu2  ;;  %v1094_v59 = vpop.f32.mrf.mxu3  ;;  %v1189_v45 = vsel %vm707_vm1, %v1165_v34, 0.0 }
 0x180   : > { %v922_v1 = vpop.f32.mrf.mxu0  ;;  %v1015_v18 = vpop.f32.mrf.mxu1  ;;  %v1867_v49 = vadd.f32 %v1094_v59, %v1023_v32  ;;  %v1190_v22 = vadd.f32 %v1189_v45, %v1188_v42  ;;  %v1141_v59 = vsel %vm707_vm1, %v1860_v51, 0.0 }
 0x181   : > { %v1016_v50 = vadd.f32 %v1015_v18, %v922_v1 }
 0x182   : > { %v1169_v60 = vmul.f32 %v1867_v49, %v1867_v49 }
 0x183   : > { %v1843_v16 = vadd.f32 %v1087_v24, %v1016_v50  ;;  %v1143_v50 = vsel %vm707_vm1, %v1867_v49, 0.0 }
 0x184   : > { %v1197_v4 = vsel %vm707_vm1, %v1169_v60, 0.0  ;;  %v1226_v60 = vld [vmem:[%s240_s6] sm:$0x1] }
 0x185   : > { %v1166_v38 = vmul.f32 %v1843_v16, %v1843_v16  ;;  %v1137_v58 = vsel %vm707_vm1, %v1843_v16, 0.0 }
 0x186   : > { %v1138_v40 = vadd.f32 %v1137_v58, %v1136_v46 }
 0x187   : > { %v1097_v30 = vpop.f32.mrf.mxu3  ;;  %v1089_v47 = vpop.f32.mrf.mxu2  ;;  %v1191_v62 = vsel %vm707_vm1, %v1166_v38, 0.0 }
 0x188   : > { %v924_v36 = vpop.f32.mrf.mxu0  ;;  %v1017_v39 = vpop.f32.mrf.mxu1  ;;  %v1874_v21 = vadd.f32 %v1097_v30, %v1026_v48  ;;  %v1192_v0 = vadd.f32 %v1191_v62, %v1190_v22 }
 0x189   : > { %v1018_v41 = vadd.f32 %v1017_v39, %v924_v36 }
 0x18a   : > { %v1170_v55 = vmul.f32 %v1874_v21, %v1874_v21  ;;  %v1145_v10 = vsel %vm707_vm1, %v1874_v21, 0.0 }
 0x18b   : > { %v1870_v13 = vadd.f32 %v1089_v47, %v1018_v41 }
 0x18c   : > { %v1199_v43 = vsel %vm707_vm1, %v1170_v55, 0.0 }
 0x18d   : > { %v1139_v54 = vsel %vm707_vm1, %v1870_v13, 0.0  ;;  %v1167_v14 = vmul.f32 %v1870_v13, %v1870_v13 }
 0x18e   : > { %v1140_v24 = vadd.f32 %v1139_v54, %v1138_v40 }
 0x18f   : > { %v1193_v29 = vsel %vm707_vm1, %v1167_v14, 0.0  ;;  %v1099_v44 = vpop.f32.mrf.mxu3 }
 0x190   : > { %v1142_v1 = vadd.f32 %v1141_v59, %v1140_v24  ;;  %v1194_v18 = vadd.f32 %v1193_v29, %v1192_v0  ;;  %v1117_v2 = vadd.f32 %v1099_v44, %v1028_v52  ;;  %v1224_v0 = vld [vmem:[%s237_s29] sm:$0x1] }
 0x192   : > { %v1196_v5 = vadd.f32 %v1195_v3, %v1194_v18  ;;  %v1144_v6 = vadd.f32 %v1143_v50, %v1142_v1  ;;  %v1171_v11 = vmul.f32 %v1117_v2, %v1117_v2  ;;  %v1147_v7 = vsel %vm707_vm1, %v1117_v2, 0.0 }
 0x194   : > { %v1146_v15 = vadd.f32 %v1145_v10, %v1144_v6  ;;  %v1198_v17 = vadd.f32 %v1197_v4, %v1196_v5  ;;  %v1201_v25 = vsel %vm707_vm1, %v1171_v11, 0.0 }
 0x196   : > { %v1148_v19 = vadd.f32 %v1147_v7, %v1146_v15  ;;  %v1200_v34 = vadd.f32 %v1199_v43, %v1198_v17 }
 0x198   : > { %v1149_v27 = vrot.slane %v1148_v19, 4  ;;  %v1202_v20 = vadd.f32 %v1201_v25, %v1200_v34 }
 0x19a   : > { %v1150_v26 = vadd.f32 %v1149_v27, %v1148_v19  ;;  %v1203_v28 = vrot.slane %v1202_v20, 4 }
 0x19c   : > { %v1151_v38 = vrot.slane %v1150_v26, 2  ;;  %v1204_v30 = vadd.f32 %v1203_v28, %v1202_v20 }
 0x19e   : > { %v1152_v32 = vadd.f32 %v1151_v38, %v1150_v26  ;;  %v1205_v33 = vrot.slane %v1204_v30, 2 }
 0x1a0   : > { %v1153_v35 = vrot.slane %v1152_v32, 1  ;;  %v1206_v36 = vadd.f32 %v1205_v33, %v1204_v30 }
 0x1a2   : > { %v1154_v39 = vadd.f32 %v1153_v35, %v1152_v32  ;;  %v1207_v45 = vrot.slane %v1206_v36, 1 }
 0x1a4   : > { %v1155_v58 = vmul.f32 0.0078125, %v1154_v39  ;;  %v1208_v41 = vadd.f32 %v1207_v45, %v1206_v36 }
 0x1a6   : > { %v1209_v42 = vmul.f32 0.0078125, %v1208_v41  ;;  %v1210_v46 = vmul.f32 %v1155_v58, %v1155_v58 }
 0x1a8   : > { %v1211_v47 = vsub.f32 %v1209_v42, %v1210_v46 }
 0x1aa   : > { %v1212_v48 = vmax.f32 %v1211_v47, 0.0 }
 0x1ac   : > { %v1213_v62 = vadd.f32 1e-05, %v1212_v48 }
 0x1ae   : > { %1454 = vrsqrt.f32 %v1213_v62  ;;  %vm1220_vm5 = vweird.f32 %v1213_v62 }
 0x1b4   : > { %v1455_v22 = vpop.eup %1454 }
 0x1b5   : > { %v1215_v40 = vmul.f32 %v1455_v22, %v1213_v62  ;;  %vm1221_vm4 = vweird.f32 %v1455_v22 }
 0x1b6   : > { %vm1222_vm6 = vmor %vm1220_vm5, %vm1221_vm4 }
 0x1b7   : > { %v1216_v53 = vmul.f32 %v1455_v22, %v1215_v40 }
 0x1b9   : > { %v1217_v54 = vmul.f32 0.5, %v1216_v53 }
 0x1bb   : > { %v1218_v14 = vsub.f32 1.5, %v1217_v54 }
 0x1bd   : > { %v1219_v52 = vmul.f32 %v1455_v22, %v1218_v14 }
 0x1bf   : > { %v1223_v24 = vsel %vm1222_vm6, %v1455_v22, %v1219_v52 }
 0x1c0   : > { %v1225_v59 = vmul.f32 %v1224_v0, %v1223_v24 }
 0x1c2   : > { %v1227_v29 = vmul.f32 %v1225_v59, %v1155_v58  ;;  %v1230_v44 = vperm.slane %v1225_v59, 0 }
 0x1c4   : > { %v1228_v1 = vsub.f32 %v1226_v60, %v1227_v29  ;;  %v1232_v18 = vmul.f32 %v1230_v44, %v1764_v57  ;;  %v1243_v3 = vmul.f32 %v1230_v44, %v1870_v13  ;;  %v1246_v50 = vmul.f32 %v1230_v44, %v1874_v21 }
 0x1c5   : > { %v1233_v55 = vmul.f32 %v1230_v44, %v1782_v9  ;;  %v1234_v5 = vmul.f32 %v1230_v44, %v1784_v61  ;;  %v1247_v6 = vmul.f32 %v1230_v44, %v1117_v2  ;;  %v1235_v10 = vmul.f32 %v1230_v44, %v1788_v56 }
 0x1c6   : > { %v1249_v4 = vperm.slane %v1228_v1, 0  ;;  %v1236_v11 = vmul.f32 %v1230_v44, %v1796_v8  ;;  %v1237_v57 = vmul.f32 %v1230_v44, %v1802_v23  ;;  %v1238_v13 = vmul.f32 %v1230_v44, %v1815_v37 }
 0x1c7   : > { %v1239_v21 = vmul.f32 %v1230_v44, %v1822_v31  ;;  %v1240_v61 = vmul.f32 %v1230_v44, %v1829_v12  ;;  %v1241_v31 = vmul.f32 %v1230_v44, %v1836_v63  ;;  %v1242_v26 = vmul.f32 %v1230_v44, %v1843_v16 }
 0x1c8   : > { %v1251_v15 = vadd.f32 %v1249_v4, %v1232_v18  ;;  %v1252_v17 = vadd.f32 %v1249_v4, %v1233_v55  ;;  %v1253_v43 = vadd.f32 %v1249_v4, %v1234_v5  ;;  %v1254_v7 = vadd.f32 %v1249_v4, %v1235_v10 }
 0x1c9   : > { %v1255_v9 = vadd.f32 %v1249_v4, %v1236_v11  ;;  %v1262_v19 = vadd.f32 %v1249_v4, %v1243_v3  ;;  %v1256_v56 = vadd.f32 %v1249_v4, %v1237_v57  ;;  %v1265_v8 = vadd.f32 %v1249_v4, %v1246_v50 }
 0x1ca   : > { %v1266_v2 = vadd.f32 %v1249_v4, %v1247_v6  ;;  %v1257_v23 = vadd.f32 %v1249_v4, %v1238_v13  ;;  %v1267_v34 = vmax.f32 %v1251_v15, 0.0  ;;  %v1268_v37 = vmax.f32 %v1252_v17, 0.0 }
 0x1cb   : > { %v1269_v25 = vmax.f32 %v1253_v43, 0.0  ;;  %v1258_v27 = vadd.f32 %v1249_v4, %v1239_v21  ;;  %v1270_v20 = vmax.f32 %v1254_v7, 0.0  ;;  %v1259_v28 = vadd.f32 %v1249_v4, %v1240_v61 }
 0x1cc   : > { %v1271_v38 = vmax.f32 %v1255_v9, 0.0  ;;  %1283 = vst.msk [vmem:[%s1920_s10] sm:$0xff] %vm707_vm1, %v1267_v34  ;;  %v1260_v12 = vadd.f32 %v1249_v4, %v1241_v31  ;;  %v1272_v30 = vmax.f32 %v1256_v56, 0.0  ;;  %v1244_v32 = vmul.f32 %v1230_v44, %v1860_v51 }
 0x1cd   : > { %1284 = vst.msk [vmem:[%s1920_s10 + $0x8] sm:$0xff] %vm707_vm1, %v1268_v37  ;;  %v1261_v63 = vadd.f32 %v1249_v4, %v1242_v26  ;;  %v1273_v33 = vmax.f32 %v1257_v23, 0.0  ;;  %v1245_v16 = vmul.f32 %v1230_v44, %v1867_v49  ;;  %v1274_v35 = vmax.f32 %v1258_v27, 0.0 }
 0x1ce   : > { %1285 = vst.msk [vmem:[%s1920_s10 + $0x10] sm:$0xff] %vm707_vm1, %v1269_v25  ;;  %v1263_v36 = vadd.f32 %v1249_v4, %v1244_v32  ;;  %v1275_v39 = vmax.f32 %v1259_v28, 0.0  ;;  %v1276_v45 = vmax.f32 %v1260_v12, 0.0  ;;  %v1278_v49 = vmax.f32 %v1262_v19, 0.0 }
 0x1cf   : > { %1286 = vst.msk [vmem:[%s1920_s10 + $0x18] sm:$0xff] %vm707_vm1, %v1270_v20  ;;  %v1264_v51 = vadd.f32 %v1249_v4, %v1245_v16  ;;  %v1277_v58 = vmax.f32 %v1261_v63, 0.0  ;;  %v1281_v46 = vmax.f32 %v1265_v8, 0.0  ;;  %v1282_v47 = vmax.f32 %v1266_v2, 0.0 }
 0x1d0   : > { %1287 = vst.msk [vmem:[%s1920_s10 + $0x20] sm:$0xff] %vm707_vm1, %v1271_v38  ;;  %v1279_v41 = vmax.f32 %v1263_v36, 0.0 }
 0x1d1   : > { %1288 = vst.msk [vmem:[%s1920_s10 + $0x28] sm:$0xff] %vm707_vm1, %v1272_v30  ;;  %v1280_v42 = vmax.f32 %v1264_v51, 0.0 }
 0x1d2   : > { %1289 = vst.msk [vmem:[%s1920_s10 + $0x30] sm:$0xff] %vm707_vm1, %v1273_v33 }
 0x1d3   : > { %1290 = vst.msk [vmem:[%s1920_s10 + $0x38] sm:$0xff] %vm707_vm1, %v1274_v35 }
 0x1d4   : > { %1291 = vst.msk [vmem:[%s1920_s10 + $0x40] sm:$0xff] %vm707_vm1, %v1275_v39 }
 0x1d5   : > { %1292 = vst.msk [vmem:[%s1920_s10 + $0x48] sm:$0xff] %vm707_vm1, %v1276_v45 }
 0x1d6   : > { %1293 = vst.msk [vmem:[%s1920_s10 + $0x50] sm:$0xff] %vm707_vm1, %v1277_v58 }
 0x1d7   : > { %1294 = vst.msk [vmem:[%s1920_s10 + $0x58] sm:$0xff] %vm707_vm1, %v1278_v49 }
 0x1d8   : > { %1295 = vst.msk [vmem:[%s1920_s10 + $0x60] sm:$0xff] %vm707_vm1, %v1279_v41 }
 0x1d9   : > { %1296 = vst.msk [vmem:[%s1920_s10 + $0x68] sm:$0xff] %vm707_vm1, %v1280_v42 }
 0x1da   : > { %1297 = vst.msk [vmem:[%s1920_s10 + $0x70] sm:$0xff] %vm707_vm1, %v1281_v46 }
 0x1db   : > { %1298 = vst.msk [vmem:[%s1920_s10 + $0x78] sm:$0xff] %vm707_vm1, %v1282_v47 }
 0x1dc PF: > { %s14_s15 = sadd.s32 1, %s1462_s15  }
 0x1dd   : > { %p11_p4 = scmp.ge.s32.totalorder %s14_s15, 8  }
 0x1df   :  { %13 = sbr.rel (!%p11_p4) target bundleno = 1 (0x1), region = 77 }

</bundles_post_ra>
